<compile_context>
chip_gen: v5e
topology: v5e:2x2
jax: 0.10.0
libtpu: 0.0.40
codegen_flags: <defaults>
</compile_context>

<pallas_src>
import jax
import jax.numpy as jnp
from jax.experimental import pallas as pl
from jax.experimental.pallas import tpu as pltpu


def _round_up(x, m):
    return (x + m - 1) // m * m


def _pick_tile(n_pad, target):
    """Largest multiple of 128 that divides n_pad and is <= target (>= 128)."""
    t = max(128, min(target, n_pad))
    t = t // 128 * 128
    while n_pad % t != 0:
        t -= 128
    return t


def _vmem_budget_bytes():
    """Generation-aware VMEM budget: ~60% of physical VMEM.

    128 MiB on v5e/v6e -> ~76 MiB budget; 64 MiB on v7x -> ~38 MiB budget.
    Falls back to the conservative v7x figure if the query is unavailable.
    """
    try:
        cap = int(pltpu.get_tpu_info().vmem_capacity_bytes)
    except Exception:
        cap = 64 * 1024 * 1024
    return int(cap * 0.6)


# --------------------------------------------------------------------------
# One-time adjacency prep (hoisted out of the per-call hot path).
# --------------------------------------------------------------------------
def prepare_adj(adj, *, use_bf16=True):
    """Pad adj to a multiple of 128 and cast once; reuse across forward calls."""
    n = adj.shape[0]
    n_pad = _round_up(n, 128)
    dt = jnp.bfloat16 if use_bf16 else jnp.float32
    return jnp.zeros((n_pad, n_pad), dt).at[:n, :n].set(adj.astype(dt))


# --------------------------------------------------------------------------
# Stage 1: seq_fts = seq @ W^T   (row-tiled, W resident, f32 matmul)
# --------------------------------------------------------------------------
def linear_kernel(seq_ref, w_ref, out_ref):
    out_ref[...] = jnp.dot(
        seq_ref[...], w_ref[...], preferred_element_type=jnp.float32
    ).astype(out_ref.dtype)


def linear_no_bias(seq_pad, weight_t_pad, *, out_dtype, tm):
    n_pad, in_pad = seq_pad.shape
    f_pad = weight_t_pad.shape[1]
    return pl.pallas_call(
        linear_kernel,
        out_shape=jax.ShapeDtypeStruct((n_pad, f_pad), out_dtype),
        grid=(n_pad // tm,),
        in_specs=[
            pl.BlockSpec((tm, in_pad), lambda i: (i, 0)),      # seq rows
            pl.BlockSpec((in_pad, f_pad), lambda i: (0, 0)),   # W^T resident
        ],
        out_specs=pl.BlockSpec((tm, f_pad), lambda i: (i, 0)),
        compiler_params=pltpu.CompilerParams(
            dimension_semantics=("parallel",)),
    )(seq_pad, weight_t_pad)


# --------------------------------------------------------------------------
# Stage 2: out = PReLU(adj @ seq_fts + bias)
#          (tiled; the f32 output block is the accumulator across k)
# --------------------------------------------------------------------------
def _make_agg_kernel(tk, sf_resident):
    def kernel(alpha_ref, adj_ref, sf_ref, bias_ref, out_ref):
        # alpha_ref: (1,)            SMEM  PReLU slope
        # adj_ref:   (tm, tk)        VMEM  bf16/f32 adj tile
        # sf_ref:    (N_pad, F_pad)  VMEM  resident   (sf_resident=True)
        #            (tk,    F_pad)  VMEM  streamed   (sf_resident=False)
        # bias_ref:  (1, F_pad)      VMEM  f32
        # out_ref:   (tm, F_pad)     VMEM  f32; same block across k -> accumulator
        k = pl.program_id(1)

        if sf_resident:
            k_off = pl.multiple_of(k * tk, tk)
            sf = sf_ref[pl.ds(k_off, tk), :]
        else:
            sf = sf_ref[...]

        partial = jnp.dot(adj_ref[...], sf, preferred_element_type=jnp.float32)

        @pl.when(k == 0)
        def _():
            out_ref[...] = partial

        @pl.when(k != 0)
        def _():
            out_ref[...] += partial

        @pl.when(k == pl.num_programs(1) - 1)
        def _():
            out = out_ref[...] + bias_ref[...]
            alpha = alpha_ref[0]
            out_ref[...] = jnp.where(out > 0, out, alpha * out)

    return kernel


def _plan_stage2(n_pad, f_pad, budget):
    """Pick (tm, tk, sf_resident) under the VMEM budget.

    tk grows preferentially (only costs the double-buffered adj tile); tm stays
    modest so n_pad // tm >= 2 keeps the parallel axis splittable (v7x megacore)
    and the resident f32 out block stays small.
    """
    # Resident seq_fts only if the worst case (double-buffered) slab leaves
    # plenty of headroom; otherwise stream it per-k.
    sf_resident = (2 * n_pad * f_pad * 2) <= budget // 4

    tm = _pick_tile(n_pad, 512)
    if n_pad >= 256:
        tm = min(tm, _pick_tile(n_pad, n_pad // 2))   # >= 2 row blocks

    def footprint(tm_, tk_):
        adj = 2 * tm_ * tk_ * 2                                    # bf16, 2 bufs
        sf = (2 * n_pad * f_pad * 2) if sf_resident else (2 * tk_ * f_pad * 2)
        out = 2 * tm_ * f_pad * 4                                  # f32 out/acc
        misc = 4 * f_pad * 4 + (1 << 20)                           # bias + slack
        return adj + sf + out + misc

    tk = _pick_tile(n_pad, 4096)
    while tk > 128 and footprint(tm, tk) > budget:
        tk = _pick_tile(n_pad, tk - 128)
    while tm > 128 and footprint(tm, tk) > budget:
        tm = _pick_tile(n_pad, tm - 128)
    return tm, tk, sf_resident


def _gcn_aggregate(adj_p, seq_fts, bias_p, alpha_arr, *, tm, tk, sf_resident,
                   single_buffer_resident, vmem_limit):
    n_pad = adj_p.shape[0]
    f_pad = seq_fts.shape[1]
    grid = (n_pad // tm, n_pad // tk)

    # Constant-index_map operands do not need double-buffering.
    resident_mode = {}
    if single_buffer_resident:
        resident_mode = dict(pipeline_mode=pl.Buffered(1))

    if sf_resident:
        sf_spec = pl.BlockSpec((n_pad, f_pad), lambda i, k: (0, 0),
                               **resident_mode)
    else:
        sf_spec = pl.BlockSpec((tk, f_pad), lambda i, k: (k, 0))
    bias_spec = pl.BlockSpec((1, f_pad), lambda i, k: (0, 0), **resident_mode)

    return pl.pallas_call(
        _make_agg_kernel(tk, sf_resident),
        out_shape=jax.ShapeDtypeStruct((n_pad, f_pad), jnp.float32),
        grid=grid,
        in_specs=[
            pl.BlockSpec(memory_space=pltpu.MemorySpace.SMEM),   # alpha
            pl.BlockSpec((tm, tk), lambda i, k: (i, k)),         # adj tile
            sf_spec,                                             # seq_fts
            bias_spec,                                           # bias
        ],
        out_specs=pl.BlockSpec((tm, f_pad), lambda i, k: (i, 0)),
        compiler_params=pltpu.CompilerParams(
            dimension_semantics=("parallel", "arbitrary"),
            vmem_limit_bytes=vmem_limit),
    )(alpha_arr, adj_p, seq_fts, bias_p)


def gcn_forward(seq, adj_p, weight_t, bias, alpha):
    """seq: [N, in_ft] (unpadded), adj_p: [N_pad, N_pad] from prepare_adj(),
    weight_t: [in_ft, out_ft], bias: [out_ft], alpha: PReLU slope.
    Returns [N, out_ft] f32."""
    n, in_ft = seq.shape
    out_ft = weight_t.shape[1]
    n_pad = adj_p.shape[0]
    assert adj_p.shape == (n_pad, n_pad) and n_pad == _round_up(n, 128)

    in_pad = _round_up(in_ft, 128)
    # Lane-dense output; round to a multiple of 256 instead if the kernel ever
    # becomes compute-bound on v6e/v7x (2x256^2 MXU width).
    f_pad = _round_up(out_ft, 128)

    budget = _vmem_budget_bytes()
    tm, tk, sf_resident = _plan_stage2(n_pad, f_pad, budget)

    # Small per-call padding (adj padding is hoisted into prepare_adj).
    seq_p = jnp.zeros((n_pad, in_pad), jnp.float32).at[:n, :in_ft].set(
        seq.astype(jnp.float32))
    w_p = jnp.zeros((in_pad, f_pad), jnp.float32).at[:in_ft, :out_ft].set(
        weight_t.astype(jnp.float32))
    bias_p = jnp.zeros((1, f_pad), jnp.float32).at[0, :out_ft].set(
        bias.astype(jnp.float32))
    alpha_arr = jnp.asarray(alpha, jnp.float32).reshape(1)

    # Stage 1: seq_fts in the adjacency's compute dtype (bf16 by default).
    seq_fts = linear_no_bias(seq_p, w_p, out_dtype=adj_p.dtype,
                             tm=_pick_tile(n_pad, 512))

    # Stage 2: prefer single-buffered resident operands; fall back to default
    # buffering if this JAX build rejects pipeline_mode=pl.Buffered(1).
    try:
        out_pad = _gcn_aggregate(
            adj_p, seq_fts, bias_p, alpha_arr, tm=tm, tk=tk,
            sf_resident=sf_resident, single_buffer_resident=True,
            vmem_limit=budget)
    except Exception:
        out_pad = _gcn_aggregate(
            adj_p, seq_fts, bias_p, alpha_arr, tm=tm, tk=tk,
            sf_resident=sf_resident, single_buffer_resident=False,
            vmem_limit=budget)

    return out_pad[:n, :out_ft]


if __name__ == "__main__":
    key = jax.random.PRNGKey(0)
    k_seq, k_adj, k_w = jax.random.split(key, 3)

    # Small shapes consistent with the module: N nodes, in_ft -> out_ft.
    N, in_ft, out_ft = 16, 32, 64

    seq = jax.random.normal(k_seq, (N, in_ft), dtype=jnp.float32)

    # Row-normalized dense "adjacency" (stand-in for the sparse adj in spmm).
    adj_raw = (jax.random.uniform(k_adj, (N, N)) > 0.7).astype(jnp.float32)
    adj_raw = adj_raw + jnp.eye(N, dtype=jnp.float32)
    adj = adj_raw / jnp.sum(adj_raw, axis=1, keepdims=True)

    # Deterministic parameter init mirroring __init__:
    #   xavier_normal_(W, gain=1.414): std = gain * sqrt(2 / (fan_in + fan_out))
    gain = 1.414
    std = gain * (2.0 / (in_ft + out_ft)) ** 0.5
    # nn.Linear weight is [out_ft, in_ft]; store its transpose for the kernel.
    weight = std * jax.random.normal(k_w, (out_ft, in_ft), dtype=jnp.float32)
    weight_t = weight.T                       # [in_ft, out_ft]
    bias = jnp.zeros((out_ft,), jnp.float32)  # bias.data.fill_(0.0)
    alpha = 0.25                              # nn.PReLU default slope

    # One-time adjacency prep (reused across calls in real use).
    adj_p = prepare_adj(adj)

    out = gcn_forward(seq, adj_p, weight_t, bias, alpha)
    out = jax.block_until_ready(out)

    # Pure-JAX f32 reference. The kernel feeds adj / seq_fts to the MXU in
    # bf16 (f32 accumulate), so tolerance is ~1e-2 rather than 1e-5.
    sf_ref = seq @ weight_t
    ref = adj @ sf_ref + bias[None, :]
    ref = jnp.where(ref > 0, ref, alpha * ref)

    assert out.shape == (N, out_ft)
    max_err = float(jnp.max(jnp.abs(out - ref)))
    assert jnp.allclose(out, ref, atol=5e-2, rtol=5e-2), max_err

    print("KERNEL_OK")
</pallas_src>

<mosaic_0001>
module attributes {stable_mosaic.version = 11 : i64} {
  func.func @linear_kernel(%arg0: i32, %arg1: memref<128x128xf32, #tpu.memory_space<vmem>>, %arg2: memref<128x128xf32, #tpu.memory_space<vmem>>, %arg3: memref<128x128xbf16, #tpu.memory_space<vmem>>) attributes {dimension_semantics = [#tpu.dimension_semantics<parallel>], iteration_bounds = array<i64: 1>, scalar_prefetch = 0 : i64, scratch_operands = 0 : i64, tpu.core_type = #tpu.core_type<tc>, window_params = [{transform_indices = @transform_0, window_bounds = array<i64: 128, 128>}, {pipeline_mode = #tpu.pipeline_mode<synchronous>, transform_indices = @transform_1, window_bounds = array<i64: 128, 128>}, {transform_indices = @transform_2, window_bounds = array<i64: 128, 128>}]} {
    %c0 = arith.constant 0 : index
    %c0_0 = arith.constant 0 : index
    %0 = vector.load %arg1[%c0, %c0_0] : memref<128x128xf32, #tpu.memory_space<vmem>>, vector<128x128xf32>
    %c0_1 = arith.constant 0 : index
    %c0_2 = arith.constant 0 : index
    %1 = vector.load %arg2[%c0_1, %c0_2] : memref<128x128xf32, #tpu.memory_space<vmem>>, vector<128x128xf32>
    %cst = arith.constant dense<0.000000e+00> : vector<128x128xf32>
    %2 = tpu.matmul %0, %1, %cst {dimension_numbers = #tpu.dot_dimension_numbers<[1], [0], [0], [1], [0, 0, 1, 1], [], []>} : vector<128x128xf32>, vector<128x128xf32>, vector<128x128xf32> -> vector<128x128xf32>
    %3 = arith.truncf %2 : vector<128x128xf32> to vector<128x128xbf16>
    %c0_3 = arith.constant 0 : index
    %c0_4 = arith.constant 0 : index
    %4 = vector.load %arg3[%c0_3, %c0_4] : memref<128x128xbf16, #tpu.memory_space<vmem>>, vector<128x128xbf16>
    tpu.vector_store %arg3[%c0_3, %c0_4], %3 {strides = array<i32>} : memref<128x128xbf16, #tpu.memory_space<vmem>>, vector<128x128xbf16>,
    return
  }
  func.func @transform_0(%arg0: i32) -> (i32, i32) {
    %c0_i32 = arith.constant 0 : i32
    %c0_i32_0 = arith.constant 0 : i32
    return %arg0, %c0_i32 : i32, i32
  }
  func.func @transform_1(%arg0: i32) -> (i32, i32) {
    %c0_i32 = arith.constant 0 : i32
    %c0_i32_0 = arith.constant 0 : i32
    %c0_i32_1 = arith.constant 0 : i32
    return %c0_i32, %c0_i32_0 : i32, i32
  }
  func.func @transform_2(%arg0: i32) -> (i32, i32) {
    %c0_i32 = arith.constant 0 : i32
    %c0_i32_0 = arith.constant 0 : i32
    return %arg0, %c0_i32 : i32, i32
  }
}

</mosaic_0001>

<bundles_post_ra>
// kernel: tpu_custom_call.1
= control target key start
LH: loop header
LB: loop body
LE: loop exit
PB: predicated region body
PF: predicated region fallthrough
CT: control target
= control target key end

     0   :  { %7 = vsyncpa [#allocation3], 0  ;;  %s404_s0 = inlined_call_operand.hbm [shape: f32[128,128], index: 0, kind: input, shape index: {}]   ;;  %s405_s1 = inlined_call_operand.hbm [shape: f32[128,128], index: 1, kind: input, shape index: {}]   ;;  %s406_s2 = inlined_call_operand.hbm [shape: bf16[128,128], index: 2, kind: output, shape index: {}]  }
   0x1   :  { %8 = vsyncpa [#allocation6], 0 }
   0x2   :  { %9 = vsyncpa [#allocation4], 0  ;;  %s14_s11 = sshll.u32 %s404_s0, 4  ;;  %s373_s12 = smov [#allocation2]   ;;  %s15_s11 = int_to_ptr.hbm [resolvable:$true] %s14_s11 }
   0x3   :  { %s16_s13 = sshll.u32 %s373_s12, 4  ;;  %s27_s16 = sshll.u32 %s405_s1, 4  ;;  %s17_s13 = int_to_ptr.vmem [resolvable:$true] %s16_s13  ;;  %s28_s16 = int_to_ptr.hbm [resolvable:$true] %s27_s16 }
   0x4   :  { %s374_s17 = smov 128   ;;  %s375_s18 = smov 8  }
   0x5   :  { %22 = dma.hbm_to_vmem [thread:$0]  %s15_s11, 2048, %s17_s13, [#allocation3], %s374_s17, %s374_s17, %s375_s18  }
   0x6   :  { %s376_s19 = smov [#allocation5]  }
   0x7   :  { %s29_s20 = sshll.u32 %s376_s19, 4  ;;  %s30_s20 = int_to_ptr.vmem [resolvable:$true] %s29_s20 }
   0x8   :  { %35 = dma.hbm_to_vmem [thread:$0]  %s28_s16, 2048, %s30_s20, [#allocation6], %s374_s17, %s374_s17, %s375_s18  }
   0x9   :  { %367 = dma.done.wait [#allocation3], 2048  }
   0xa   :  { %368 = vsyncadd [#allocation3], 4294965248 }
   0xb   :  { %369 = dma.done.wait [#allocation6], 2048  }
   0xc   :  { %370 = vsyncadd [#allocation6], 4294965248  ;;  %v75_v0 = vld [vmem:[#allocation5 + $0x78] sm:$0xff]  ;;  %v74_v1 = vld [vmem:[#allocation5 + $0x70] sm:$0xff]  ;;  %s377_s0 = smov [#allocation7]   ;;  %s179_s23 = sshll.u32 %s406_s2, 4  ;;  %s180_s23 = int_to_ptr.hbm [resolvable:$true] %s179_s23 }
   0xd   :  { %76 = vmatpush.msra.mxu0 %v75_v0  ;;  %240 = vmatpush.msra.mxu1 %v75_v0  ;;  %v73_v2 = vld [vmem:[#allocation5 + $0x68] sm:$0xff]  ;;  %v72_v3 = vld [vmem:[#allocation5 + $0x60] sm:$0xff]  ;;  %v71_v4 = vld [vmem:[#allocation5 + $0x58] sm:$0xff]  ;;  %s177_s1 = sshll.u32 %s377_s0, 4  ;;  %s378_s24 = smov 64   ;;  %s178_s1 = int_to_ptr.vmem [resolvable:$true] %s177_s1 }
   0xe   :  { %241 = vmatpush.msra.mxu2 %v75_v0  ;;  %242 = vmatpush.msra.mxu3 %v75_v0  ;;  %v70_v5 = vld [vmem:[#allocation5 + $0x50] sm:$0xff]  ;;  %v69_v6 = vld [vmem:[#allocation5 + $0x48] sm:$0xff]  ;;  %v68_v7 = vld [vmem:[#allocation5 + $0x40] sm:$0xff]  ;;  %s379_s25 = smov 4  }
   0xf   :  { %77 = vmatpush.msra.mxu0 %v74_v1  ;;  %243 = vmatpush.msra.mxu1 %v74_v1  ;;  %v67_v8 = vld [vmem:[#allocation5 + $0x38] sm:$0xff]  ;;  %v66_v9 = vld [vmem:[#allocation5 + $0x30] sm:$0xff]  ;;  %v65_v10 = vld [vmem:[#allocation5 + $0x28] sm:$0xff] }
  0x10   :  { %244 = vmatpush.msra.mxu2 %v74_v1  ;;  %245 = vmatpush.msra.mxu3 %v74_v1  ;;  %v64_v11 = vld [vmem:[#allocation5 + $0x20] sm:$0xff]  ;;  %v63_v12 = vld [vmem:[#allocation5 + $0x18] sm:$0xff]  ;;  %v62_v13 = vld [vmem:[#allocation5 + $0x10] sm:$0xff] }
  0x11   :  { %78 = vmatpush.msra.mxu0 %v73_v2  ;;  %246 = vmatpush.msra.mxu1 %v73_v2  ;;  %v61_v14 = vld [vmem:[#allocation5 + $0x8] sm:$0xff]  ;;  %v60_v15 = vld [vmem:[#allocation5] sm:$0xff]  ;;  %v46_v24 = vld [vmem:[#allocation2 + $0x10] sm:$0xff] }
  0x12   :  { %247 = vmatpush.msra.mxu2 %v73_v2  ;;  %248 = vmatpush.msra.mxu3 %v73_v2  ;;  %v44_v16 = vld [vmem:[#allocation2] sm:$0xff]  ;;  %v45_v20 = vld [vmem:[#allocation2 + $0x8] sm:$0xff]  ;;  %v50_v25 = vld [vmem:[#allocation2 + $0x30] sm:$0xff] }
  0x13   :  { %79 = vmatpush.msra.mxu0 %v72_v3  ;;  %249 = vmatpush.msra.mxu1 %v72_v3  ;;  %v48_v17 = vld [vmem:[#allocation2 + $0x20] sm:$0xff]  ;;  %v49_v21 = vld [vmem:[#allocation2 + $0x28] sm:$0xff]  ;;  %v54_v26 = vld [vmem:[#allocation2 + $0x50] sm:$0xff] }
  0x14   :  { %250 = vmatpush.msra.mxu2 %v72_v3  ;;  %251 = vmatpush.msra.mxu3 %v72_v3  ;;  %v52_v18 = vld [vmem:[#allocation2 + $0x40] sm:$0xff]  ;;  %v53_v22 = vld [vmem:[#allocation2 + $0x48] sm:$0xff]  ;;  %v58_v27 = vld [vmem:[#allocation2 + $0x70] sm:$0xff] }
  0x15   :  { %80 = vmatpush.msra.mxu0 %v71_v4  ;;  %252 = vmatpush.msra.mxu1 %v71_v4  ;;  %v56_v19 = vld [vmem:[#allocation2 + $0x60] sm:$0xff]  ;;  %v57_v23 = vld [vmem:[#allocation2 + $0x68] sm:$0xff]  ;;  %v47_v28 = vld [vmem:[#allocation2 + $0x18] sm:$0xff] }
  0x16   :  { %253 = vmatpush.msra.mxu2 %v71_v4  ;;  %254 = vmatpush.msra.mxu3 %v71_v4  ;;  %v51_v29 = vld [vmem:[#allocation2 + $0x38] sm:$0xff] }
  0x17   :  { %81 = vmatpush.msra.mxu0 %v70_v5  ;;  %255 = vmatpush.msra.mxu1 %v70_v5  ;;  %v55_v30 = vld [vmem:[#allocation2 + $0x58] sm:$0xff] }
  0x18   :  { %256 = vmatpush.msra.mxu2 %v70_v5  ;;  %257 = vmatpush.msra.mxu3 %v70_v5  ;;  %v59_v31 = vld [vmem:[#allocation2 + $0x78] sm:$0xff] }
  0x19   :  { %82 = vmatpush.msra.mxu0 %v69_v6  ;;  %258 = vmatpush.msra.mxu1 %v69_v6 }
  0x1a   :  { %259 = vmatpush.msra.mxu2 %v69_v6  ;;  %260 = vmatpush.msra.mxu3 %v69_v6 }
  0x1b   :  { %83 = vmatpush.msra.mxu0 %v68_v7  ;;  %261 = vmatpush.msra.mxu1 %v68_v7 }
  0x1c   :  { %262 = vmatpush.msra.mxu2 %v68_v7  ;;  %263 = vmatpush.msra.mxu3 %v68_v7 }
  0x1d   :  { %84 = vmatpush.msra.mxu0 %v67_v8  ;;  %264 = vmatpush.msra.mxu1 %v67_v8 }
  0x1e   :  { %265 = vmatpush.msra.mxu2 %v67_v8  ;;  %266 = vmatpush.msra.mxu3 %v67_v8 }
  0x1f   :  { %85 = vmatpush.msra.mxu0 %v66_v9  ;;  %267 = vmatpush.msra.mxu1 %v66_v9 }
  0x20   :  { %268 = vmatpush.msra.mxu2 %v66_v9  ;;  %269 = vmatpush.msra.mxu3 %v66_v9 }
  0x21   :  { %86 = vmatpush.msra.mxu0 %v65_v10  ;;  %270 = vmatpush.msra.mxu1 %v65_v10 }
  0x22   :  { %271 = vmatpush.msra.mxu2 %v65_v10  ;;  %272 = vmatpush.msra.mxu3 %v65_v10 }
  0x23   :  { %87 = vmatpush.msra.mxu0 %v64_v11  ;;  %273 = vmatpush.msra.mxu1 %v64_v11 }
  0x24   :  { %274 = vmatpush.msra.mxu2 %v64_v11  ;;  %275 = vmatpush.msra.mxu3 %v64_v11 }
  0x25   :  { %88 = vmatpush.msra.mxu0 %v63_v12  ;;  %276 = vmatpush.msra.mxu1 %v63_v12 }
  0x26   :  { %277 = vmatpush.msra.mxu2 %v63_v12  ;;  %278 = vmatpush.msra.mxu3 %v63_v12 }
  0x27   :  { %89 = vmatpush.msra.mxu0 %v62_v13  ;;  %279 = vmatpush.msra.mxu1 %v62_v13 }
  0x28   :  { %280 = vmatpush.msra.mxu2 %v62_v13  ;;  %281 = vmatpush.msra.mxu3 %v62_v13 }
  0x29   :  { %90 = vmatpush.msra.mxu0 %v61_v14  ;;  %282 = vmatpush.msra.mxu1 %v61_v14 }
  0x2a   :  { %283 = vmatpush.msra.mxu2 %v61_v14  ;;  %284 = vmatpush.msra.mxu3 %v61_v14 }
  0x2b   :  { %91 = vmatpush.msra.mxu0 %v60_v15  ;;  %285 = vmatpush.msra.mxu1 %v60_v15 }
  0x2c   :  { %286 = vmatpush.msra.mxu2 %v60_v15  ;;  %287 = vmatpush.msra.mxu3 %v60_v15 }
  0x2d   :  { %92 = vmatmul.f32.vlgmr.msra.gmra.mxu0 %v44_v16  ;;  %104 = vmatmul.f32.vlgmr.msra.gmra.mxu1 %v48_v17 }
  0x2e   :  { %116 = vmatmul.f32.vlgmr.msra.gmra.mxu2 %v52_v18  ;;  %128 = vmatmul.f32.vlgmr.msra.gmra.mxu3 %v56_v19 }
  0x35   :  { %95 = vmatmul.f32.gmra.mxu0 %v45_v20  ;;  %107 = vmatmul.f32.gmra.mxu1 %v49_v21 }
  0x36   :  { %119 = vmatmul.f32.gmra.mxu2 %v53_v22  ;;  %131 = vmatmul.f32.gmra.mxu3 %v57_v23 }
  0x3d   :  { %98 = vmatmul.f32.gmra.mxu0 %v46_v24  ;;  %110 = vmatmul.f32.gmra.mxu1 %v50_v25 }
  0x3e   :  { %122 = vmatmul.f32.gmra.mxu2 %v54_v26  ;;  %134 = vmatmul.f32.gmra.mxu3 %v58_v27 }
  0x45   :  { %101 = vmatmul.f32.gmra.mxu0 %v47_v28  ;;  %113 = vmatmul.f32.gmra.mxu1 %v51_v29 }
  0x46   :  { %125 = vmatmul.f32.gmra.mxu2 %v55_v30  ;;  %137 = vmatmul.f32.gmra.mxu3 %v59_v31 }
  0xaa   :  { %v93_v32 = vpop.f32.mrf.mxu0  ;;  %v105_v33 = vpop.f32.mrf.mxu1 }
  0xb1   :  { %v117_v34 = vpop.f32.mrf.mxu2  ;;  %v129_v35 = vpop.f32.mrf.mxu3 }
  0xb2   :  { %v96_v36 = vpop.f32.mrf.mxu0  ;;  %v108_v37 = vpop.f32.mrf.mxu1 }
  0xb3   :  { %v196_v38 = vpack.c.bf16 %v96_v36, %v93_v32  ;;  %v206_v39 = vpack.c.bf16 %v108_v37, %v105_v33 }
  0xb5   :  { %197 = vst [vmem:[#allocation7] sm:$0xff] %v196_v38  }
  0xb6   :  { %234 = vst [vmem:[#allocation7 + $0x10] sm:$0xff] %v206_v39  }
  0xb9   :  { %v120_v40 = vpop.f32.mrf.mxu2  ;;  %v132_v41 = vpop.f32.mrf.mxu3 }
  0xba   :  { %v216_v42 = vpack.c.bf16 %v120_v40, %v117_v34  ;;  %v226_v43 = vpack.c.bf16 %v132_v41, %v129_v35  ;;  %v99_v44 = vpop.f32.mrf.mxu0  ;;  %v111_v45 = vpop.f32.mrf.mxu1 }
  0xbc   :  { %236 = vst [vmem:[#allocation7 + $0x20] sm:$0xff] %v216_v42  }
  0xbd   :  { %238 = vst [vmem:[#allocation7 + $0x30] sm:$0xff] %v226_v43  }
  0xc1   :  { %v123_v46 = vpop.f32.mrf.mxu2  ;;  %v135_v47 = vpop.f32.mrf.mxu3 }
  0xc2   :  { %v102_v48 = vpop.f32.mrf.mxu0  ;;  %v114_v49 = vpop.f32.mrf.mxu1 }
  0xc3   :  { %v201_v50 = vpack.c.bf16 %v102_v48, %v99_v44  ;;  %v211_v51 = vpack.c.bf16 %v114_v49, %v111_v45 }
  0xc5   :  { %233 = vst [vmem:[#allocation7 + $0x8] sm:$0xff] %v201_v50  }
  0xc6   :  { %235 = vst [vmem:[#allocation7 + $0x18] sm:$0xff] %v211_v51  }
  0xc9   :  { %v126_v52 = vpop.f32.mrf.mxu2  ;;  %v138_v53 = vpop.f32.mrf.mxu3 }
  0xca   :  { %v221_v54 = vpack.c.bf16 %v126_v52, %v123_v46  ;;  %v231_v55 = vpack.c.bf16 %v138_v53, %v135_v47 }
  0xcc   :  { %237 = vst [vmem:[#allocation7 + $0x28] sm:$0xff] %v221_v54  }
  0xcd   :  { %239 = vst [vmem:[#allocation7 + $0x38] sm:$0xff] %v231_v55  }
  0xce   :  { %185 = dma.vmem_to_hbm [thread:$0]  %s178_s1, 1024, %s180_s23, [#allocation4], %s378_s24, %s378_s24, %s379_s25  }
  0xcf   :  { %371 = dma.done.wait [#allocation4], 1024  }
  0xd0   :  { %372 = vsyncadd [#allocation4], 4294966272 }
  0xd1   :  { %190 = vsyncpa [#allocation3], 1 }
  0xd2   :  { %191 = vsyncpa [#allocation6], 1 }
  0xd3   :  { %192 = vsyncpa [#allocation4], 1 }

</bundles_post_ra>
